<compile_context>
chip_gen: v7x
topology: tpu7x:2x2x1
jax: 0.10.0
libtpu: 0.0.40
codegen_flags: <defaults>
</compile_context>

<pallas_src>
import functools
import math

import jax
import jax.numpy as jnp
from jax.experimental import pallas as pl
from jax.experimental.pallas import tpu as pltpu


def _bce_dice_kernel(x_ref, y_ref, o_ref, bce_acc, xy_acc, xs_acc, ys_acc):
    """Streams one (TR/8, 8, LD) block of one sample and accumulates partials.

    x_ref, y_ref : (TR/8, 8, LD) logits / targets block of sample i
    o_ref        : (8, 128) per-sample output; lanes 0..3 of row 0 hold
                   [bce_sum, sum(sig*y), sum(sig), sum(y)] after the last chunk
    *_acc        : (8, LD) lane-dense f32 VMEM accumulators
    """
    j = pl.program_id(1)

    @pl.when(j == 0)
    def _():
        bce_acc[...] = jnp.zeros_like(bce_acc)
        xy_acc[...] = jnp.zeros_like(xy_acc)
        xs_acc[...] = jnp.zeros_like(xs_acc)
        ys_acc[...] = jnp.zeros_like(ys_acc)

    x = x_ref[...].astype(jnp.float32)
    y = y_ref[...].astype(jnp.float32)

    # Shared transcendental: e = exp(-|x|) feeds both BCE and the sigmoid.
    e = jnp.exp(-jnp.abs(x))
    # Numerically stable BCE-with-logits: max(x,0) - x*y + log1p(exp(-|x|)).
    bce = jnp.maximum(x, 0.0) - x * y + jnp.log1p(e)
    # sigmoid(x) = where(x>=0, 1, e) / (1 + e)   (exact; stays bit-close to ref)
    s = jnp.where(x >= 0.0, 1.0, e) / (1.0 + e)

    # Fold the leading vreg-group axis (pure VPU adds) into lane-dense accs.
    bce_acc[...] += jnp.sum(bce, axis=0)
    xy_acc[...] += jnp.sum(s * y, axis=0)
    xs_acc[...] += jnp.sum(s, axis=0)
    ys_acc[...] += jnp.sum(y, axis=0)

    # Final cross-lane reduction + pack: once per sample, at the last chunk.
    @pl.when(j == pl.num_programs(1) - 1)
    def _():
        bce_s = jnp.sum(bce_acc[...])
        xy_s = jnp.sum(xy_acc[...])
        xs_s = jnp.sum(xs_acc[...])
        ys_s = jnp.sum(ys_acc[...])
        lane = jax.lax.broadcasted_iota(jnp.int32, o_ref.shape, 1)
        o_ref[...] = jnp.where(
            lane == 0, bce_s,
            jnp.where(lane == 1, xy_s,
                      jnp.where(lane == 2, xs_s, ys_s)))


@functools.partial(jax.jit, static_argnames=("tile_rows", "lanes"))
def bce_dice_loss(logits, target, tile_rows=512, lanes=512):
    n = logits.shape[0]
    d = math.prod(logits.shape[1:])

    x = logits.reshape(n, d)
    y = target.reshape(n, d)

    # Per-sample 2D layout: rows of `lanes` elements, row count padded up to a
    # multiple of the per-step row tile TR (itself a multiple of 8 sublanes).
    ld = lanes                                # multiple of 128
    r = -(-d // ld)                           # rows per sample (ceil)
    tr = min(tile_rows, -(-r // 8) * 8)       # rows per grid step, multiple of 8
    r_pad = -(-r // tr) * tr
    d_pad = r_pad * ld

    if d_pad != d:
        # logits = -1000, target = 0 contribute exactly zero to every sum
        # (exp(-1000) underflows to 0, so bce = 0 and sigmoid = 0 exactly).
        x = jnp.pad(x, ((0, 0), (0, d_pad - d)), constant_values=-1000.0)
        y = jnp.pad(y, ((0, 0), (0, d_pad - d)), constant_values=0.0)

    x4 = x.reshape(n, r_pad // 8, 8, ld)
    y4 = y.reshape(n, r_pad // 8, 8, ld)
    num_chunks = r_pad // tr
    blk_rows = tr // 8

    partials = pl.pallas_call(
        _bce_dice_kernel,
        out_shape=jax.ShapeDtypeStruct((n, 8, 128), jnp.float32),
        grid_spec=pltpu.PrefetchScalarGridSpec(
            num_scalar_prefetch=0,
            grid=(n, num_chunks),
            in_specs=[
                pl.BlockSpec((None, blk_rows, 8, ld), lambda i, j: (i, j, 0, 0)),
                pl.BlockSpec((None, blk_rows, 8, ld), lambda i, j: (i, j, 0, 0)),
            ],
            out_specs=pl.BlockSpec((None, 8, 128), lambda i, j: (i, 0, 0)),
            scratch_shapes=[
                pltpu.VMEM((8, ld), jnp.float32),
                pltpu.VMEM((8, ld), jnp.float32),
                pltpu.VMEM((8, ld), jnp.float32),
                pltpu.VMEM((8, ld), jnp.float32),
            ],
        ),
        compiler_params=pltpu.CompilerParams(
            dimension_semantics=("parallel", "arbitrary"),
            vmem_limit_bytes=32 * 1024 * 1024,
        ),
    )(x4, y4)

    smooth = 1e-05
    bce_sum = partials[:, 0, 0]
    xy_sum = partials[:, 0, 1]
    xs_sum = partials[:, 0, 2]
    ys_sum = partials[:, 0, 3]

    bce = jnp.sum(bce_sum) / (n * d)          # mean over ORIGINAL element count
    dice = (2.0 * xy_sum + smooth) / (xs_sum + ys_sum + smooth)
    dice = 1.0 - jnp.sum(dice) / n
    return 0.5 * bce + dice


def _reference_bce_dice_loss(logits, target):
    """Pure-JAX reference mirroring the PyTorch module exactly."""
    x = logits.astype(jnp.float32)
    y = target.astype(jnp.float32)
    bce = jnp.mean(jnp.maximum(x, 0.0) - x * y + jnp.log1p(jnp.exp(-jnp.abs(x))))
    smooth = 1e-05
    s = jax.nn.sigmoid(x)
    n = x.shape[0]
    s = s.reshape(n, -1)
    yf = y.reshape(n, -1)
    inter = s * yf
    dice = (2.0 * inter.sum(1) + smooth) / (s.sum(1) + yf.sum(1) + smooth)
    dice = 1.0 - dice.sum() / n
    return 0.5 * bce + dice


if __name__ == "__main__":
    key = jax.random.PRNGKey(0)
    k1, k2 = jax.random.split(key)

    # NCHW inputs, as the PyTorch module would receive from a segmentation net.
    batch, channels, spatial = 2, 4, 16
    logits = jax.random.normal(k1, (batch, channels, spatial, spatial), dtype=jnp.float32)
    target = (jax.random.uniform(k2, (batch, channels, spatial, spatial)) > 0.5).astype(jnp.float32)

    loss = bce_dice_loss(logits, target)
    loss = jax.block_until_ready(loss)

    ref = _reference_bce_dice_loss(logits, target)
    assert jnp.allclose(loss, ref, atol=1e-5, rtol=1e-5), (loss, ref)

    print("KERNEL_OK")
</pallas_src>

<mosaic_0001>
module attributes {stable_mosaic.version = 11 : i64} {
  func.func @_bce_dice_kernel(%arg0: i32, %arg1: i32, %arg2: memref<1x1x8x512xf32, #tpu.memory_space<vmem>>, %arg3: memref<1x1x8x512xf32, #tpu.memory_space<vmem>>, %arg4: memref<1x8x128xf32, #tpu.memory_space<vmem>>, %arg5: memref<8x512xf32, #tpu.memory_space<vmem>>, %arg6: memref<8x512xf32, #tpu.memory_space<vmem>>, %arg7: memref<8x512xf32, #tpu.memory_space<vmem>>, %arg8: memref<8x512xf32, #tpu.memory_space<vmem>>) attributes {dimension_semantics = [#tpu.dimension_semantics<parallel>, #tpu.dimension_semantics<arbitrary>], iteration_bounds = array<i64: 2, 1>, scalar_prefetch = 0 : i64, scratch_operands = 4 : i64, tpu.core_type = #tpu.core_type<tc>, window_params = [{transform_indices = @transform_0, window_bounds = array<i64: 1, 1, 8, 512>}, {transform_indices = @transform_1, window_bounds = array<i64: 1, 1, 8, 512>}, {transform_indices = @transform_2, window_bounds = array<i64: 1, 8, 128>}]} {
    %c0_i32 = arith.constant 0 : i32
    %0 = arith.cmpi eq, %arg1, %c0_i32 : i32
    %1 = arith.extui %0 : i1 to i32
    %c0_i32_0 = arith.constant 0 : i32
    %2 = arith.cmpi ne, %1, %c0_i32_0 : i32
    scf.if %2 {
      %cst_34 = arith.constant 0.000000e+00 : f32
      %44 = vector.broadcast %cst_34 : f32 to vector<8x512xf32>
      %c0_35 = arith.constant 0 : index
      %c0_36 = arith.constant 0 : index
      %45 = vector.load %arg5[%c0_35, %c0_36] : memref<8x512xf32, #tpu.memory_space<vmem>>, vector<8x512xf32>
      tpu.vector_store %arg5[%c0_35, %c0_36], %44 {strides = array<i32>} : memref<8x512xf32, #tpu.memory_space<vmem>>, vector<8x512xf32>,
      %cst_37 = arith.constant 0.000000e+00 : f32
      %46 = vector.broadcast %cst_37 : f32 to vector<8x512xf32>
      %c0_38 = arith.constant 0 : index
      %c0_39 = arith.constant 0 : index
      %47 = vector.load %arg6[%c0_38, %c0_39] : memref<8x512xf32, #tpu.memory_space<vmem>>, vector<8x512xf32>
      tpu.vector_store %arg6[%c0_38, %c0_39], %46 {strides = array<i32>} : memref<8x512xf32, #tpu.memory_space<vmem>>, vector<8x512xf32>,
      %cst_40 = arith.constant 0.000000e+00 : f32
      %48 = vector.broadcast %cst_40 : f32 to vector<8x512xf32>
      %c0_41 = arith.constant 0 : index
      %c0_42 = arith.constant 0 : index
      %49 = vector.load %arg7[%c0_41, %c0_42] : memref<8x512xf32, #tpu.memory_space<vmem>>, vector<8x512xf32>
      tpu.vector_store %arg7[%c0_41, %c0_42], %48 {strides = array<i32>} : memref<8x512xf32, #tpu.memory_space<vmem>>, vector<8x512xf32>,
      %cst_43 = arith.constant 0.000000e+00 : f32
      %50 = vector.broadcast %cst_43 : f32 to vector<8x512xf32>
      %c0_44 = arith.constant 0 : index
      %c0_45 = arith.constant 0 : index
      %51 = vector.load %arg8[%c0_44, %c0_45] : memref<8x512xf32, #tpu.memory_space<vmem>>, vector<8x512xf32>
      tpu.vector_store %arg8[%c0_44, %c0_45], %50 {strides = array<i32>} : memref<8x512xf32, #tpu.memory_space<vmem>>, vector<8x512xf32>,
    } else {
    }
    %c0 = arith.constant 0 : index
    %c0_1 = arith.constant 0 : index
    %c0_2 = arith.constant 0 : index
    %c0_3 = arith.constant 0 : index
    %3 = vector.load %arg2[%c0, %c0_1, %c0_2, %c0_3] : memref<1x1x8x512xf32, #tpu.memory_space<vmem>>, vector<1x1x8x512xf32>
    %4 = vector.shape_cast %3 : vector<1x1x8x512xf32> to vector<1x8x512xf32>
    %c0_4 = arith.constant 0 : index
    %c0_5 = arith.constant 0 : index
    %c0_6 = arith.constant 0 : index
    %c0_7 = arith.constant 0 : index
    %5 = vector.load %arg3[%c0_4, %c0_5, %c0_6, %c0_7] : memref<1x1x8x512xf32, #tpu.memory_space<vmem>>, vector<1x1x8x512xf32>
    %6 = vector.shape_cast %5 : vector<1x1x8x512xf32> to vector<1x8x512xf32>
    %7 = math.absf %4 : vector<1x8x512xf32>
    %cst = arith.constant 0.000000e+00 : f32
    %8 = vector.broadcast %cst : f32 to vector<1x8x512xf32>
    %9 = arith.subf %8, %7 : vector<1x8x512xf32>
    %10 = math.exp %9 : vector<1x8x512xf32>
    %cst_8 = arith.constant 0.000000e+00 : f32
    %11 = vector.broadcast %cst_8 : f32 to vector<1x8x512xf32>
    %12 = arith.maximumf %4, %11 : vector<1x8x512xf32>
    %13 = arith.mulf %4, %6 : vector<1x8x512xf32>
    %14 = arith.subf %12, %13 : vector<1x8x512xf32>
    %15 = math.log1p %10 : vector<1x8x512xf32>
    %16 = arith.addf %14, %15 : vector<1x8x512xf32>
    %cst_9 = arith.constant 0.000000e+00 : f32
    %17 = vector.broadcast %cst_9 : f32 to vector<1x8x512xf32>
    %18 = arith.cmpf oge, %4, %17 : vector<1x8x512xf32>
    %cst_10 = arith.constant 1.000000e+00 : f32
    %19 = vector.broadcast %cst_10 : f32 to vector<1x8x512xf32>
    %20 = arith.select %18, %19, %10 : vector<1x8x512xi1>, vector<1x8x512xf32>
    %cst_11 = arith.constant 1.000000e+00 : f32
    %21 = vector.broadcast %cst_11 : f32 to vector<1x8x512xf32>
    %22 = arith.addf %21, %10 : vector<1x8x512xf32>
    %23 = arith.divf %20, %22 : vector<1x8x512xf32>
    %c0_12 = arith.constant 0 : index
    %c0_13 = arith.constant 0 : index
    %24 = vector.load %arg5[%c0_12, %c0_13] : memref<8x512xf32, #tpu.memory_space<vmem>>, vector<8x512xf32>
    %cst_14 = arith.constant dense<0.000000e+00> : vector<8x512xf32>
    %25 = vector.multi_reduction <add>, %16, %cst_14 [0] : vector<1x8x512xf32> to vector<8x512xf32>
    %26 = arith.addf %24, %25 : vector<8x512xf32>
    %c0_15 = arith.constant 0 : index
    %c0_16 = arith.constant 0 : index
    %27 = vector.load %arg5[%c0_15, %c0_16] : memref<8x512xf32, #tpu.memory_space<vmem>>, vector<8x512xf32>
    tpu.vector_store %arg5[%c0_15, %c0_16], %26 {strides = array<i32>} : memref<8x512xf32, #tpu.memory_space<vmem>>, vector<8x512xf32>,
    %c0_17 = arith.constant 0 : index
    %c0_18 = arith.constant 0 : index
    %28 = vector.load %arg6[%c0_17, %c0_18] : memref<8x512xf32, #tpu.memory_space<vmem>>, vector<8x512xf32>
    %29 = arith.mulf %23, %6 : vector<1x8x512xf32>
    %cst_19 = arith.constant dense<0.000000e+00> : vector<8x512xf32>
    %30 = vector.multi_reduction <add>, %29, %cst_19 [0] : vector<1x8x512xf32> to vector<8x512xf32>
    %31 = arith.addf %28, %30 : vector<8x512xf32>
    %c0_20 = arith.constant 0 : index
    %c0_21 = arith.constant 0 : index
    %32 = vector.load %arg6[%c0_20, %c0_21] : memref<8x512xf32, #tpu.memory_space<vmem>>, vector<8x512xf32>
    tpu.vector_store %arg6[%c0_20, %c0_21], %31 {strides = array<i32>} : memref<8x512xf32, #tpu.memory_space<vmem>>, vector<8x512xf32>,
    %c0_22 = arith.constant 0 : index
    %c0_23 = arith.constant 0 : index
    %33 = vector.load %arg7[%c0_22, %c0_23] : memref<8x512xf32, #tpu.memory_space<vmem>>, vector<8x512xf32>
    %cst_24 = arith.constant dense<0.000000e+00> : vector<8x512xf32>
    %34 = vector.multi_reduction <add>, %23, %cst_24 [0] : vector<1x8x512xf32> to vector<8x512xf32>
    %35 = arith.addf %33, %34 : vector<8x512xf32>
    %c0_25 = arith.constant 0 : index
    %c0_26 = arith.constant 0 : index
    %36 = vector.load %arg7[%c0_25, %c0_26] : memref<8x512xf32, #tpu.memory_space<vmem>>, vector<8x512xf32>
    tpu.vector_store %arg7[%c0_25, %c0_26], %35 {strides = array<i32>} : memref<8x512xf32, #tpu.memory_space<vmem>>, vector<8x512xf32>,
    %c0_27 = arith.constant 0 : index
    %c0_28 = arith.constant 0 : index
    %37 = vector.load %arg8[%c0_27, %c0_28] : memref<8x512xf32, #tpu.memory_space<vmem>>, vector<8x512xf32>
    %cst_29 = arith.constant dense<0.000000e+00> : vector<8x512xf32>
    %38 = vector.multi_reduction <add>, %6, %cst_29 [0] : vector<1x8x512xf32> to vector<8x512xf32>
    %39 = arith.addf %37, %38 : vector<8x512xf32>
    %c0_30 = arith.constant 0 : index
    %c0_31 = arith.constant 0 : index
    %40 = vector.load %arg8[%c0_30, %c0_31] : memref<8x512xf32, #tpu.memory_space<vmem>>, vector<8x512xf32>
    tpu.vector_store %arg8[%c0_30, %c0_31], %39 {strides = array<i32>} : memref<8x512xf32, #tpu.memory_space<vmem>>, vector<8x512xf32>,
    %c0_i32_32 = arith.constant 0 : i32
    %41 = arith.cmpi eq, %arg1, %c0_i32_32 : i32
    %42 = arith.extui %41 : i1 to i32
    %c0_i32_33 = arith.constant 0 : i32
    %43 = arith.cmpi ne, %42, %c0_i32_33 : i32
    scf.if %43 {
      %c0_34 = arith.constant 0 : index
      %c0_35 = arith.constant 0 : index
      %44 = vector.load %arg5[%c0_34, %c0_35] : memref<8x512xf32, #tpu.memory_space<vmem>>, vector<8x512xf32>
      %45 = vector.shape_cast %44 : vector<8x512xf32> to vector<1x8x512xf32>
      %cst_36 = arith.constant dense<0.000000e+00> : vector<1xf32>
      %46 = vector.multi_reduction <add>, %45, %cst_36 [1, 2] : vector<1x8x512xf32> to vector<1xf32>
      %47 = vector.shape_cast %46 : vector<1xf32> to vector<1x1x1xf32>
      %48 = vector.extract %47[0, 0, 0] : f32 from vector<1x1x1xf32>
      %c0_37 = arith.constant 0 : index
      %c0_38 = arith.constant 0 : index
      %49 = vector.load %arg6[%c0_37, %c0_38] : memref<8x512xf32, #tpu.memory_space<vmem>>, vector<8x512xf32>
      %50 = vector.shape_cast %49 : vector<8x512xf32> to vector<1x8x512xf32>
      %cst_39 = arith.constant dense<0.000000e+00> : vector<1xf32>
      %51 = vector.multi_reduction <add>, %50, %cst_39 [1, 2] : vector<1x8x512xf32> to vector<1xf32>
      %52 = vector.shape_cast %51 : vector<1xf32> to vector<1x1x1xf32>
      %53 = vector.extract %52[0, 0, 0] : f32 from vector<1x1x1xf32>
      %c0_40 = arith.constant 0 : index
      %c0_41 = arith.constant 0 : index
      %54 = vector.load %arg7[%c0_40, %c0_41] : memref<8x512xf32, #tpu.memory_space<vmem>>, vector<8x512xf32>
      %55 = vector.shape_cast %54 : vector<8x512xf32> to vector<1x8x512xf32>
      %cst_42 = arith.constant dense<0.000000e+00> : vector<1xf32>
      %56 = vector.multi_reduction <add>, %55, %cst_42 [1, 2] : vector<1x8x512xf32> to vector<1xf32>
      %57 = vector.shape_cast %56 : vector<1xf32> to vector<1x1x1xf32>
      %58 = vector.extract %57[0, 0, 0] : f32 from vector<1x1x1xf32>
      %c0_43 = arith.constant 0 : index
      %c0_44 = arith.constant 0 : index
      %59 = vector.load %arg8[%c0_43, %c0_44] : memref<8x512xf32, #tpu.memory_space<vmem>>, vector<8x512xf32>
      %60 = vector.shape_cast %59 : vector<8x512xf32> to vector<1x8x512xf32>
      %cst_45 = arith.constant dense<0.000000e+00> : vector<1xf32>
      %61 = vector.multi_reduction <add>, %60, %cst_45 [1, 2] : vector<1x8x512xf32> to vector<1xf32>
      %62 = vector.shape_cast %61 : vector<1xf32> to vector<1x1x1xf32>
      %63 = vector.extract %62[0, 0, 0] : f32 from vector<1x1x1xf32>
      %64 = tpu.iota {dimensions = array<i32: 1>} : vector<8x128xi32>
      %c0_i32_46 = arith.constant 0 : i32
      %65 = vector.broadcast %c0_i32_46 : i32 to vector<8x128xi32>
      %66 = arith.cmpi eq, %64, %65 : vector<8x128xi32>
      %c1_i32 = arith.constant 1 : i32
      %67 = vector.broadcast %c1_i32 : i32 to vector<8x128xi32>
      %68 = arith.cmpi eq, %64, %67 : vector<8x128xi32>
      %c2_i32 = arith.constant 2 : i32
      %69 = vector.broadcast %c2_i32 : i32 to vector<8x128xi32>
      %70 = arith.cmpi eq, %64, %69 : vector<8x128xi32>
      %71 = vector.broadcast %58 : f32 to vector<8x128xf32>
      %72 = vector.broadcast %63 : f32 to vector<8x128xf32>
      %73 = arith.select %70, %71, %72 : vector<8x128xi1>, vector<8x128xf32>
      %74 = vector.broadcast %53 : f32 to vector<8x128xf32>
      %75 = arith.select %68, %74, %73 : vector<8x128xi1>, vector<8x128xf32>
      %76 = vector.broadcast %48 : f32 to vector<8x128xf32>
      %77 = arith.select %66, %76, %75 : vector<8x128xi1>, vector<8x128xf32>
      %c0_47 = arith.constant 0 : index
      %c0_48 = arith.constant 0 : index
      %c0_49 = arith.constant 0 : index
      %78 = vector.load %arg4[%c0_47, %c0_48, %c0_49] : memref<1x8x128xf32, #tpu.memory_space<vmem>>, vector<1x8x128xf32>
      %79 = vector.shape_cast %78 : vector<1x8x128xf32> to vector<8x128xf32>
      %80 = vector.shape_cast %77 : vector<8x128xf32> to vector<1x8x128xf32>
      tpu.vector_store %arg4[%c0_47, %c0_48, %c0_49], %80 {strides = array<i32>} : memref<1x8x128xf32, #tpu.memory_space<vmem>>, vector<1x8x128xf32>,
    } else {
    }
    return
  }
  func.func @transform_0(%arg0: i32, %arg1: i32) -> (i32, i32, i32, i32) {
    %c0_i32 = arith.constant 0 : i32
    %c0_i32_0 = arith.constant 0 : i32
    %c0_i32_1 = arith.constant 0 : i32
    return %arg0, %arg1, %c0_i32, %c0_i32_0 : i32, i32, i32, i32
  }
  func.func @transform_1(%arg0: i32, %arg1: i32) -> (i32, i32, i32, i32) {
    %c0_i32 = arith.constant 0 : i32
    %c0_i32_0 = arith.constant 0 : i32
    %c0_i32_1 = arith.constant 0 : i32
    return %arg0, %arg1, %c0_i32, %c0_i32_0 : i32, i32, i32, i32
  }
  func.func @transform_2(%arg0: i32, %arg1: i32) -> (i32, i32, i32) {
    %c0_i32 = arith.constant 0 : i32
    %c0_i32_0 = arith.constant 0 : i32
    %c0_i32_1 = arith.constant 0 : i32
    return %arg0, %c0_i32, %c0_i32_0 : i32, i32, i32
  }
}

</mosaic_0001>

<bundles_post_ra>
// kernel: bce_dice_loss.1
= control target key start
LH: loop header
LB: loop body
LE: loop exit
PB: predicated region body
PF: predicated region fallthrough
CT: control target
= control target key end

     0   :  { %s666_s9 = smov 0   ;;  %s668_s10 = smov 0   ;;  %s780_s0 = inlined_call_operand.vmem [shape: f32[2,1,8,512], index: 0, kind: input, shape index: {}]   ;;  %s781_s1 = inlined_call_operand.vmem [shape: f32[2,1,8,512], index: 1, kind: input, shape index: {}]   ;;  %s782_s2 = inlined_call_operand.vmem [shape: f32[2,8,128], index: 2, kind: output, shape index: {}]  }
   0x1   :  { %s670_s11 = smov 0  }
   0x2 LB: > { %s24_s12 = sadd.s32 1, %s645_s10  ;;  %p561_p0 = scmp.ge.s32.totalorder %s649_s11, 1  ;;  %s649_s11 = sphi %s670_s11, %s12_s11   ;;  %s645_s10 = sphi %s668_s10, %s790_s10   ;;  %s641_s9 = sphi %s666_s9, %s789_s9  }
   0x3   : > { %p26_p1 = scmp.ge.s32.totalorder %s24_s12, 2  ;;  %p146_p2 = scmp.lt.s32.totalorder %s649_s11, 3 }
   0x5   : > { %s792_s12 = smov (%p26_p1, %s24_s12), 0  ;;  %p147_p3 = pnand %p561_p0, %p146_p2 }
   0x6   : > { %p180_p4 = scmp.lt.s32.totalorder (!%p147_p3), %s641_s9, 1 }
   0x7   : > { %150 = sbr.rel (%p147_p3) target bundleno = 279 (0x117), region = 28 }
   0xe   : > { %s794_s9 = smov (!%p180_p4, %s641_s9), 1 }
   0xf   : > { %s569_s13 = sshll.u32 %s794_s9, 5  ;;  %s566_s23 = sshll.u32 %s794_s9, 3 }
  0x10   : > { %s188_s16 = scalar_lea.vmem %s780_s0, %s569_s13  ;;  %s197_s19 = scalar_lea.vmem %s781_s1, %s569_s13 }
  0x11   : > { %v222_v0 = vld [vmem:[%s188_s16] sm:$0xff]  ;;  %v690_v1 = vld [vmem:[%s188_s16 + $0x8] sm:$0xff]  ;;  %v692_v2 = vld [vmem:[%s188_s16 + $0x10] sm:$0xff]  ;;  %s201_s27 = scalar_lea.vmem %s782_s2, %s566_s23 }
  0x12   : > { %v694_v3 = vld [vmem:[%s188_s16 + $0x18] sm:$0xff]  ;;  %v230_v4 = vand.u32 2147483647, %v222_v0  ;;  %v231_v5 = vand.u32 2147483647, %v690_v1  ;;  %v226_v24 = vld [vmem:[%s197_s19] sm:$0xff] }
  0x13   : > { %v232_v6 = vand.u32 2147483647, %v692_v2  ;;  %v233_v7 = vand.u32 2147483647, %v694_v3  ;;  %vm298_vm0 = vcmp.ge.f32.partialorder %v222_v0, 0.0  ;;  %vm299_vm1 = vcmp.ge.f32.partialorder %v690_v1, 0.0 }
  0x14   : > { %v234_v8 = vsub.f32 0.0, %v230_v4  ;;  %v235_v9 = vsub.f32 0.0, %v231_v5  ;;  %v227_v25 = vld [vmem:[%s197_s19 + $0x8] sm:$0xff]  ;;  %vm300_vm2 = vcmp.ge.f32.partialorder %v692_v2, 0.0  ;;  %vm301_vm3 = vcmp.ge.f32.partialorder %v694_v3, 0.0  ;;  %v714_v26 = vld [vmem:[%s197_s19 + $0x10] sm:$0xff] }
  0x15   : > { %v236_v10 = vsub.f32 0.0, %v232_v6  ;;  %v237_v11 = vsub.f32 0.0, %v233_v7  ;;  %v246_v27 = vmax.f32 %v222_v0, 0.0  ;;  %v716_v28 = vld [vmem:[%s197_s19 + $0x18] sm:$0xff]  ;;  %v247_v29 = vmax.f32 %v690_v1, 0.0 }
  0x16   : > { %v238_v12 = vmul.f32 1.442695, %v234_v8  ;;  %v240_v13 = vmul.f32 1.442695, %v235_v9  ;;  %v250_v30 = vmul.f32 %v226_v24, %v222_v0  ;;  %v248_v32 = vmax.f32 %v692_v2, 0.0 }
  0x17   : > { %v242_v14 = vmul.f32 1.442695, %v236_v10  ;;  %v244_v15 = vmul.f32 1.442695, %v237_v11  ;;  %v251_v33 = vmul.f32 %v227_v25, %v690_v1  ;;  %v249_v35 = vmax.f32 %v694_v3, 0.0 }
  0x18   : > { %603 = vpow2.f32 %v238_v12  ;;  %v252_v36 = vmul.f32 %v714_v26, %v692_v2  ;;  %v253_v39 = vmul.f32 %v716_v28, %v694_v3  ;;  %v441_v41 = vadd.f32 %v227_v25, %v226_v24 }
  0x19   : > { %605 = vpow2.f32 %v240_v13  ;;  %v254_v43 = vsub.f32 %v246_v27, %v250_v30  ;;  %v255_v48 = vsub.f32 %v247_v29, %v251_v33 }
  0x1a   : > { %607 = vpow2.f32 %v242_v14  ;;  %v256_v54 = vsub.f32 %v248_v32, %v252_v36  ;;  %v442_v60 = vadd.f32 %v441_v41, %v714_v26 }
  0x1b   : > { %609 = vpow2.f32 %v244_v15 }
  0x1c   : > { %v443_v33 = vadd.f32 %v442_v60, %v716_v28 }
  0x22   : > { %v604_v16 = vpop.eup %603 }
  0x23   : > { %v699_v17 = vpop.eup %605  ;;  %v258_v18 = vadd.f32 1.0, %v604_v16  ;;  %v261_v31 = vmul.f32 -0.5, %v604_v16  ;;  %v302_v38 = vsel %vm298_vm0, 1.0, %v604_v16  ;;  %v264_v45 = vand.u32 2147483647, %v604_v16 }
  0x24   : > { %v701_v19 = vpop.eup %607  ;;  %v267_v20 = vadd.f32 1.0, %v699_v17  ;;  %v270_v34 = vmul.f32 -0.5, %v699_v17  ;;  %v303_v42 = vsel %vm299_vm1, 1.0, %v699_v17  ;;  %v273_v50 = vand.u32 2147483647, %v699_v17 }
  0x25   : > { %v707_v21 = vpop.eup %609  ;;  %v276_v22 = vadd.f32 1.0, %v701_v19  ;;  %611 = vrcp.f32 %v258_v18  ;;  %v279_v37 = vmul.f32 -0.5, %v701_v19  ;;  %v262_v44 = vadd.f32 1.0, %v261_v31 }
  0x26   : > { %v285_v23 = vadd.f32 1.0, %v707_v21  ;;  %613 = vrcp.f32 %v267_v20  ;;  %v288_v40 = vmul.f32 -0.5, %v707_v21  ;;  %v304_v47 = vsel %vm300_vm2, 1.0, %v701_v19 }
  0x27   : > { %615 = vrcp.f32 %v276_v22  ;;  %v271_v49 = vadd.f32 1.0, %v270_v34  ;;  %v305_v52 = vsel %vm301_vm3, 1.0, %v707_v21  ;;  %v280_v55 = vadd.f32 1.0, %v279_v37 }
  0x28   : > { %617 = vrcp.f32 %v285_v23  ;;  %v282_v58 = vand.u32 2147483647, %v701_v19  ;;  %v289_v59 = vadd.f32 1.0, %v288_v40  ;;  %v263_v63 = vmul.f32 %v604_v16, %v262_v44 }
  0x29   : > { %619 = vlog2.f32 %v258_v18  ;;  %vm742_vm4 = vcmp.lt.f32.partialorder %v264_v45, 0.0004427343  ;;  %v291_v1 = vand.u32 2147483647, %v707_v21  ;;  %v272_v5 = vmul.f32 %v699_v17, %v271_v49 }
  0x2a   : > { %621 = vlog2.f32 %v267_v20  ;;  %vm748_vm5 = vcmp.lt.f32.partialorder %v273_v50, 0.0004427343  ;;  %v281_v9 = vmul.f32 %v701_v19, %v280_v55  ;;  %vm753_vm6 = vcmp.lt.f32.partialorder %v282_v58, 0.0004427343 }
  0x2b   : > { %623 = vlog2.f32 %v276_v22  ;;  %v290_v16 = vmul.f32 %v707_v21, %v289_v59  ;;  %v257_v18 = vsub.f32 %v249_v35, %v253_v39  ;;  %vm292_vm7 = vcmp.lt.f32.partialorder %v291_v1, 0.0004427343 }
  0x2c   : > { %625 = vlog2.f32 %v285_v23 }
  0x2f   : > { %v612_v46 = vpop.eup %611 }
  0x30   : > { %v614_v51 = vpop.eup %613  ;;  %v311_v53 = vmul.f32 %v612_v46, %v302_v38 }
  0x31   : > { %v616_v56 = vpop.eup %615  ;;  %v313_v57 = vmul.f32 %v614_v51, %v303_v42 }
  0x32   : > { %v618_v61 = vpop.eup %617  ;;  %v315_v62 = vmul.f32 %v616_v56, %v304_v47  ;;  %v338_v10 = vmul.f32 %v311_v53, %v226_v24 }
  0x33   : > { %v620_v2 = vpop.eup %619  ;;  %v317_v3 = vmul.f32 %v618_v61, %v305_v52  ;;  %v425_v4 = vadd.f32 %v313_v57, %v311_v53  ;;  %v339_v11 = vmul.f32 %v313_v57, %v227_v25 }
  0x34   : > { %v622_v7 = vpop.eup %621  ;;  %v260_v8 = vmul.f32 0.6931472, %v620_v2  ;;  %v340_v30 = vmul.f32 %v315_v62, %v714_v26 }
  0x35   : > { %v624_v12 = vpop.eup %623  ;;  %v426_v13 = vadd.f32 %v425_v4, %v315_v62  ;;  %v269_v14 = vmul.f32 0.6931472, %v622_v7  ;;  %v409_v21 = vadd.f32 %v339_v11, %v338_v10  ;;  %v341_v37 = vmul.f32 %v317_v3, %v716_v28 }
  0x36   : > { %v626_v17 = vpop.eup %625  ;;  %v266_v20 = vsel %vm742_vm4, %v263_v63, %v260_v8  ;;  %v278_v22 = vmul.f32 0.6931472, %v624_v12 }
  0x37   : > { %v427_v23 = vadd.f32 %v426_v13, %v317_v3  ;;  %v275_v19 = vsel %vm748_vm5, %v272_v5, %v269_v14  ;;  %v287_v24 = vmul.f32 0.6931472, %v626_v17  ;;  %v294_v25 = vadd.f32 %v266_v20, %v254_v43 }
  0x38   : > { %v284_v27 = vsel %vm753_vm6, %v281_v9, %v278_v22  ;;  %v295_v29 = vadd.f32 %v275_v19, %v255_v48  ;;  %v410_v38 = vadd.f32 %v409_v21, %v340_v30  ;;  %v453_v3 = vlaneseq }
  0x39   : > { %428 = vadd.xlane.f32.xlu1 %v427_v23  ;;  %v293_v31 = vsel %vm292_vm7, %v290_v16, %v287_v24  ;;  %v296_v32 = vadd.f32 %v284_v27, %v256_v54 }
  0x3a   : > { %v297_v34 = vadd.f32 %v293_v31, %v257_v18  ;;  %v393_v35 = vadd.f32 %v295_v29, %v294_v25  ;;  %v411_v40 = vadd.f32 %v410_v38, %v341_v37  ;;  %v454_v4 = vand.u32 127, %v453_v3 }
  0x3c   : > { %v394_v36 = vadd.f32 %v393_v35, %v296_v32  ;;  %vm457_vm8 = vcmp.eq.s32.totalorder %v454_v4, 2  ;;  %vm456_vm9 = vcmp.eq.s32.totalorder %v454_v4, 1  ;;  %vm455_vm10 = vcmp.eq.s32.totalorder %v454_v4, 0 }
  0x3d   : > { %444 = vadd.xlane.f32.xlu1 %v443_v33 }
  0x3e   : > { %v395_v39 = vadd.f32 %v394_v36, %v297_v34 }
  0x40   : > { %396 = vadd.xlane.f32.xlu0 %v395_v39 }
  0x44   : > { %412 = vadd.xlane.f32.xlu0 %v411_v40 }
  0xc6   : > { %v429_v41 = vpop.xlane.xlu1 %428 }
  0xc7   : > { %v430_v42 = vrot.slane %v429_v41, 4 }
  0xc9   : > { %v431_v44 = vadd.f32 %v430_v42, %v429_v41 }
  0xca   : > { %v445_v26 = vpop.xlane.xlu1 %444 }
  0xcb   : > { %v446_v43 = vrot.slane %v445_v26, 4  ;;  %v432_v49 = vrot.slane %v431_v44, 2 }
  0xcd   : > { %v397_v45 = vpop.xlane.xlu0 %396  ;;  %v447_v47 = vadd.f32 %v446_v43, %v445_v26  ;;  %v433_v55 = vadd.f32 %v432_v49, %v431_v44 }
  0xce   : > { %v398_v46 = vrot.slane %v397_v45, 4 }
  0xcf   : > { %v448_v52 = vrot.slane %v447_v47, 2  ;;  %v434_v61 = vrot.slane %v433_v55, 1 }
  0xd0   : > { %v399_v48 = vadd.f32 %v398_v46, %v397_v45 }
  0xd1   : > { %v413_v50 = vpop.xlane.xlu0 %412  ;;  %v449_v56 = vadd.f32 %v448_v52, %v447_v47  ;;  %v435_v1 = vadd.f32 %v434_v61, %v433_v55 }
  0xd2   : > { %v400_v51 = vrot.slane %v399_v48, 2  ;;  %v414_v28 = vrot.slane %v413_v50, 4 }
  0xd3   : > { %v450_v63 = vrot.slane %v449_v56, 1 }
  0xd4   : > { %v415_v53 = vadd.f32 %v414_v28, %v413_v50  ;;  %v401_v54 = vadd.f32 %v400_v51, %v399_v48 }
  0xd5   : > { %v451_v2 = vadd.f32 %v450_v63, %v449_v56 }
  0xd6   : > { %v416_v57 = vrot.slane %v415_v53, 2  ;;  %v402_v58 = vrot.slane %v401_v54, 1 }
  0xd8   : > { %v417_v59 = vadd.f32 %v416_v57, %v415_v53  ;;  %v403_v60 = vadd.f32 %v402_v58, %v401_v54 }
  0xda   : > { %571 = vpush %v403_v60  ;;  %v418_v62 = vrot.slane %v417_v59, 1 }
  0xdc   : > { %v419_v0 = vadd.f32 %v418_v62, %v417_v59 }
  0xde   : > { %573 = vpush %v419_v0 }
  0xdf   : > { %575 = vpush %v435_v1 }
  0xe0   : > { %577 = vpush %v451_v2 }
 0x10b   : > { %s572_s20 = spop %571 }
 0x10c   : > { %v463_v9 = vstv %s572_s20 }
 0x10f   : > { %s574_s21 = spop %573 }
 0x110   : > { %s576_s22 = spop %575  ;;  %v461_v5 = vstv %s574_s21 }
 0x111   : > { %v458_v6 = vstv %s576_s22  ;;  %s578_s24 = spop %577 }
 0x112   : > { %v459_v7 = vstv %s578_s24 }
 0x113   : > { %v460_v8 = vsel %vm457_vm8, %v458_v6, %v459_v7 }
 0x114   : > { %v462_v10 = vsel %vm456_vm9, %v461_v5, %v460_v8 }
 0x115   : > { %v464_v11 = vsel %vm455_vm10, %v463_v9, %v462_v10 }
 0x116   : > { %465 = vst [vmem:[%s201_s27] sm:$0xff] %v464_v11 }
 0x117 PF: > { %s12_s11 = sadd.s32 1, %s649_s11   ;;  %s789_s9 = smov %s645_s10 }
 0x118   : > { %p9_p5 = scmp.ge.s32.totalorder %s12_s11, 4   ;;  %s790_s10 = smov %s792_s12 }
 0x11a   :  { %11 = sbr.rel (!%p9_p5) target bundleno = 2 (0x2), region = 69 }

</bundles_post_ra>
